<compile_context>
chip_gen: v7x
topology: tpu7x:2x2x1
jax: 0.10.0
libtpu: 0.0.40
codegen_flags: <defaults>
</compile_context>

<pallas_src>
import math
import functools

import jax
import jax.numpy as jnp
from jax.experimental import pallas as pl
from jax.experimental.pallas import tpu as pltpu


# ----------------------------- pe table --------------------------------------


def make_positional_encoding(d_model: int, max_len: int = 1000) -> jnp.ndarray:
    """Builds the [max_len, d_model] sinusoidal table exactly like the torch code."""
    position = jnp.arange(max_len, dtype=jnp.float32)[:, None]            # [max_len, 1]
    div_term = jnp.exp(
        jnp.arange(0, d_model, 2, dtype=jnp.float32) * (-math.log(10000.0) / d_model)
    )                                                                      # [ceil(D/2)]
    sin_part = jnp.sin(position * div_term)                                # [max_len, ceil(D/2)]
    cos_part = jnp.cos(position * div_term)[:, : d_model // 2]             # [max_len, D//2]
    pe = jnp.zeros((max_len, d_model), dtype=jnp.float32)
    pe = pe.at[:, 0::2].set(sin_part)
    pe = pe.at[:, 1::2].set(cos_part)
    return pe


# ----------------------------- tiling helpers ---------------------------------

_LANE = 128
_SUBLANE = 8
_TARGET_BLOCK_BYTES = 2 * 1024 * 1024     # per-buffer target; safe on v5e/v6e/v7x
_MAX_ROW_BYTES = 64 * 1024                # cap one tile-row at 64 KiB


def _pick_tiles(b: int, n: int, itemsize: int):
    """Pick (row_tile, col_tile) for a [b, n] slab.

    col_tile is a multiple of 128 that divides n (lane-dense, unmasked stores),
    or the full n.  row_tile is a multiple of 8 that divides b (or the full b),
    capped so one block stays around _TARGET_BLOCK_BYTES.
    """
    col_cap = max(_LANE, _MAX_ROW_BYTES // itemsize)
    if n % _LANE == 0 and n > col_cap:
        tc = _LANE
        c = _LANE
        while c <= col_cap:
            if n % c == 0:
                tc = c
            c += _LANE
    else:
        tc = n  # full dim is always a legal block extent

    row_cap = max(1, _TARGET_BLOCK_BYTES // (tc * itemsize))
    if b <= row_cap:
        tb = b
    else:
        tb = None
        r = _SUBLANE
        while r <= row_cap:
            if b % r == 0:
                tb = r
            r += _SUBLANE
        if tb is None:
            # TODO(synk): no multiple-of-8 divisor of b fits the budget; fall back
            #             to the full batch dim (still correct, just a bigger block).
            tb = b
    return tb, tc


# ----------------------------- kernels ----------------------------------------


def _pe_add_kernel(x_ref, pe_ref, o_ref):
    # x_ref: (TB, TC), pe_ref: (1, TC) broadcast over rows.
    o_ref[...] = (x_ref[...] + pe_ref[...]).astype(o_ref.dtype)


def _pe_add_dropout_kernel(x_ref, pe_ref, bits_ref, o_ref, *, threshold: int, scale: float):
    # Inverted dropout: keep iff bits >= threshold (threshold = rate * 2^32).
    y = x_ref[...] + pe_ref[...]
    keep = bits_ref[...] >= jnp.uint32(threshold)
    o_ref[...] = jnp.where(keep, y * scale, jnp.zeros_like(y)).astype(o_ref.dtype)


# ----------------------------- wrapper -----------------------------------------


def positional_encoding_forward(
    x: jnp.ndarray,
    pe_table: jnp.ndarray,
    *,
    dropout_rate: float = 0.1,
    training: bool = False,
    rng_key=None,
) -> jnp.ndarray:
    """x: [B, S, D].  pe_table: [max_len, D] float32."""
    B, S, D = x.shape
    N = S * D

    # Lane-dense flatten; pe cast to the input dtype so the whole kernel stays
    # in x.dtype.
    x2 = x.reshape(B, N)
    pe2 = pe_table[:S, :].astype(x.dtype).reshape(1, N)

    itemsize = jnp.dtype(x.dtype).itemsize
    tb, tc = _pick_tiles(B, N, itemsize)
    grid = (B // tb, N // tc)

    x_spec = pl.BlockSpec((tb, tc), lambda i, j: (i, j))
    pe_spec = pl.BlockSpec((1, tc), lambda i, j: (0, j))
    out_spec = pl.BlockSpec((tb, tc), lambda i, j: (i, j))

    cparams = pltpu.CompilerParams(
        dimension_semantics=("parallel", "parallel"),   # independent axes -> 2 TCs on v7x
        vmem_limit_bytes=32 * 1024 * 1024,              # safe headroom on all generations
    )

    if (not training) or dropout_rate == 0.0:
        out2 = pl.pallas_call(
            _pe_add_kernel,
            out_shape=jax.ShapeDtypeStruct((B, N), x.dtype),
            grid_spec=pltpu.PrefetchScalarGridSpec(
                num_scalar_prefetch=0,
                grid=grid,
                in_specs=[x_spec, pe_spec],
                out_specs=out_spec,
            ),
            compiler_params=cparams,
        )(x2, pe2)
        return out2.reshape(B, S, D)

    if rng_key is None:
        rng_key = jax.random.PRNGKey(0)
    # TODO(synk): in-kernel pltpu.prng_seed/prng_random_bits would avoid this extra
    #             uint32 HBM stream, but they have no interpret/CPU lowering, so the
    #             random bits are generated outside the kernel and streamed in.
    bits = jax.random.bits(rng_key, (B, N), dtype=jnp.uint32)
    threshold = min(int(round(dropout_rate * (1 << 32))), (1 << 32) - 1)
    scale = 1.0 / (1.0 - dropout_rate)
    kernel = functools.partial(_pe_add_dropout_kernel, threshold=threshold, scale=scale)

    bits_spec = pl.BlockSpec((tb, tc), lambda i, j: (i, j))
    out2 = pl.pallas_call(
        kernel,
        out_shape=jax.ShapeDtypeStruct((B, N), x.dtype),
        grid_spec=pltpu.PrefetchScalarGridSpec(
            num_scalar_prefetch=0,
            grid=grid,
            in_specs=[x_spec, pe_spec, bits_spec],
            out_specs=out_spec,
        ),
        compiler_params=cparams,
    )(x2, pe2, bits)
    return out2.reshape(B, S, D)


# ----------------------------- main --------------------------------------------


if __name__ == "__main__":
    B, S, D = 2, 8, 32
    MAX_LEN = 1000
    key = jax.random.PRNGKey(0)
    x = jax.random.normal(key, (B, S, D), dtype=jnp.float32)

    pe_table = make_positional_encoding(D, MAX_LEN)

    # Eval-mode forward (dropout is identity) — the deterministic path.
    out = positional_encoding_forward(x, pe_table, dropout_rate=0.1, training=False)
    out = jax.block_until_ready(out)

    ref = x + pe_table[None, :S, :]
    assert out.shape == (B, S, D)
    assert jnp.allclose(out, ref, atol=1e-6), "eval-path mismatch vs reference"

    # Training path: every output must be either 0 (dropped) or (x+pe)/(1-p) (kept).
    rate = 0.1
    out_train = positional_encoding_forward(
        x, pe_table, dropout_rate=rate, training=True, rng_key=jax.random.PRNGKey(123)
    )
    out_train = jax.block_until_ready(out_train)
    assert out_train.shape == (B, S, D)
    scaled = ref / (1.0 - rate)
    ok = jnp.isclose(out_train, scaled, atol=1e-5) | (out_train == 0.0)
    assert bool(jnp.all(ok)), "training-path values must be 0 or scaled (x + pe)"

    print("KERNEL_OK")
</pallas_src>

<mosaic_0001>
module attributes {stable_mosaic.version = 11 : i64} {
  func.func @_pe_add_kernel(%arg0: i32, %arg1: i32, %arg2: memref<2x256xf32, #tpu.memory_space<vmem>>, %arg3: memref<1x256xf32, #tpu.memory_space<vmem>>, %arg4: memref<2x256xf32, #tpu.memory_space<vmem>>) attributes {dimension_semantics = [#tpu.dimension_semantics<parallel>, #tpu.dimension_semantics<parallel>], iteration_bounds = array<i64: 1, 1>, scalar_prefetch = 0 : i64, scratch_operands = 0 : i64, tpu.core_type = #tpu.core_type<tc>, window_params = [{transform_indices = @transform_0, window_bounds = array<i64: 2, 256>}, {transform_indices = @transform_1, window_bounds = array<i64: 1, 256>}, {transform_indices = @transform_2, window_bounds = array<i64: 2, 256>}]} {
    %c0 = arith.constant 0 : index
    %c0_0 = arith.constant 0 : index
    %0 = vector.load %arg2[%c0, %c0_0] : memref<2x256xf32, #tpu.memory_space<vmem>>, vector<2x256xf32>
    %c0_1 = arith.constant 0 : index
    %c0_2 = arith.constant 0 : index
    %1 = vector.load %arg3[%c0_1, %c0_2] : memref<1x256xf32, #tpu.memory_space<vmem>>, vector<1x256xf32>
    %2 = vector.broadcast %1 : vector<1x256xf32> to vector<2x256xf32>
    %3 = arith.addf %0, %2 : vector<2x256xf32>
    %c0_3 = arith.constant 0 : index
    %c0_4 = arith.constant 0 : index
    %4 = vector.load %arg4[%c0_3, %c0_4] : memref<2x256xf32, #tpu.memory_space<vmem>>, vector<2x256xf32>
    tpu.vector_store %arg4[%c0_3, %c0_4], %3 {strides = array<i32>} : memref<2x256xf32, #tpu.memory_space<vmem>>, vector<2x256xf32>,
    return
  }
  func.func @transform_0(%arg0: i32, %arg1: i32) -> (i32, i32) {
    %c0_i32 = arith.constant 0 : i32
    return %arg0, %arg1 : i32, i32
  }
  func.func @transform_1(%arg0: i32, %arg1: i32) -> (i32, i32) {
    %c0_i32 = arith.constant 0 : i32
    %c0_i32_0 = arith.constant 0 : i32
    return %c0_i32, %arg1 : i32, i32
  }
  func.func @transform_2(%arg0: i32, %arg1: i32) -> (i32, i32) {
    %c0_i32 = arith.constant 0 : i32
    return %arg0, %arg1 : i32, i32
  }
}

</mosaic_0001>

<bundles_post_ra>
// kernel: tpu_custom_call.1
= control target key start
LH: loop header
LB: loop body
LE: loop exit
PB: predicated region body
PF: predicated region fallthrough
CT: control target
= control target key end

     0   :  { %7 = vsyncpa [#allocation3], 0  ;;  %s157_s0 = inlined_call_operand.hbm [shape: f32[2,256], index: 0, kind: input, shape index: {}]   ;;  %s158_s1 = inlined_call_operand.vmem [shape: f32[1,256], index: 1, kind: input, shape index: {}]   ;;  %s159_s2 = inlined_call_operand.hbm [shape: f32[2,256], index: 2, kind: output, shape index: {}]  }
   0x1   :  { %8 = vsyncpa [#allocation4], 0  ;;  %s112_s9 = smov [#allocation2]   ;;  %s64_s13 = scalar_lea.hbm %s157_s0, 64 }
   0x2   :  { %s15_s10 = sshll.u32 %s112_s9, 4  ;;  %p65_p0 = scmp.ne.s32.totalorder %s157_s0, %s64_s13  ;;  %s16_s10 = int_to_ptr.vmem [resolvable:$true] %s15_s10 }
   0x3   :  { %p68_p1 = scmp.lt.u32.totalorder %s64_s13, %s157_s0 }
   0x5   :  { %p70_p2 = pnand %p68_p1, %p65_p0 }
   0x7   :  { %73 = shalt.err (!%p70_p2)
}
   0x8   :  { %s74_s18 = scalar_lea.vmem %s16_s10, 64  ;;  %p79_p4 = scmp.lt.s32.totalorder %s16_s10, %s16_s10 }
   0x9   :  { %p75_p3 = scmp.ne.s32.totalorder %s16_s10, %s74_s18  ;;  %p80_p5 = scmp.lt.s32.totalorder %s74_s18, %s74_s18 }
   0xb   :  { %p81_p6 = por %p80_p5, %p79_p4 }
   0xd   :  { %p82_p7 = pnand %p81_p6, %p75_p3 }
   0xf   :  { %85 = shalt.err (!%p82_p7)
}
  0x10   :  { %18 = dma.hbm_to_vmem [thread:$0]  %s157_s0, 64, %s16_s10, [#allocation3]  }
  0x11   :  { %108 = dma.done.wait [#allocation3], 64  }
  0x12   :  { %109 = vsyncadd [#allocation3], 4294967232  ;;  %v27_v0 = vlaneseq  ;;  %v113_v1 = vmov 1983009808   ;;  %v25_v7 = vld [vmem:[%s158_s1] sm:$0x3] }
  0x13   :  { %v37_v2 = vunpack.c.l.s4 %v113_v1  ;;  %v24_v12 = vld [vmem:[#allocation2] sm:$0xf]  ;;  %s114_s23 = smov [#allocation5]  }
  0x14   :  { %v28_v3 = vshrl.u32 %v27_v0, 7  ;;  %s52_s0 = sshll.u32 %s114_s23, 4  ;;  %s53_s0 = int_to_ptr.vmem [resolvable:$true] %s52_s0 }
  0x15   :  { %v38_v6 = vunpack.c.0.s8 %v37_v2  ;;  %s86_s24 = scalar_lea.vmem %s53_s0, 64  ;;  %p91_p9 = scmp.lt.s32.totalorder %s53_s0, %s53_s0 }
  0x16   :  { %v29_v4 = vsub.s32 0, %v28_v3  ;;  %v33_v5 = vsub.s32 1, %v28_v3  ;;  %p87_p8 = scmp.ne.s32.totalorder %s53_s0, %s86_s24  ;;  %p92_p10 = scmp.lt.s32.totalorder %s86_s24, %s86_s24 }
  0x17   :  { %v41_v10 = vsub.s32 %v38_v6, %v28_v3 }
  0x18   :  { %v30_v8 = vrot.slane %v25_v7, %v29_v4  ;;  %v34_v9 = vrot.slane %v25_v7, %v33_v5  ;;  %p93_p11 = por %p92_p10, %p91_p9 }
  0x1a   :  { %v35_v11 = vcombine.low %v30_v8, %v34_v9  ;;  %p94_p12 = pnand %p93_p11, %p87_p8 }
  0x1c   :  { %v42_v13 = vrot.slane %v35_v11, %v41_v10 }
  0x1e   :  { %v44_v14 = vadd.f32 %v42_v13, %v24_v12 }
  0x20   :  { %45 = vst [vmem:[#allocation5] sm:$0xf] %v44_v14 }
  0x21   :  { %97 = shalt.err (!%p94_p12)
}
  0x22   :  { %s98_s26 = scalar_lea.hbm %s159_s2, 64 }
  0x23   :  { %p99_p13 = scmp.ne.s32.totalorder %s159_s2, %s98_s26  ;;  %p102_p0 = scmp.lt.u32.totalorder %s98_s26, %s159_s2 }
  0x25   :  { %p104_p1 = pnand %p102_p0, %p99_p13 }
  0x27   :  { %107 = shalt.err (!%p104_p1)
}
  0x28   :  { %55 = dma.vmem_to_hbm [thread:$0]  %s53_s0, 64, %s159_s2, [#allocation4]  }
  0x29   :  { %110 = dma.done.wait [#allocation4], 64  }
  0x2a   :  { %111 = vsyncadd [#allocation4], 4294967232 }
  0x2b   :  { %59 = vsyncpa [#allocation3], 1 }
  0x2c   :  { %60 = vsyncpa [#allocation4], 1 }

</bundles_post_ra>
